<compile_context>
chip_gen: v7x
topology: tpu7x:2x2x1
jax: 0.10.0
libtpu: 0.0.40
codegen_flags: <defaults>
</compile_context>

<pallas_src>
import jax
import jax.numpy as jnp
from jax.experimental import pallas as pl
from jax.experimental.pallas import tpu as pltpu


def interacting_layer(x, w_query, w_key, w_value, w_res, att_embedding_size, head_num):
    """x: (B, F, E) float32.  w_*: (E, att_embedding_size * head_num) float32.
    Returns (B, F, att_embedding_size * head_num), matching the PyTorch module."""
    B, Fdim, E = x.shape
    D, H = att_embedding_size, head_num
    HD = H * D

    # Fuse all projection weights into one (E, 4*H*D) matrix: [Q | K | V | Res],
    # each block keeping the original head-major column order (torch.split on dim=2).
    w_all = jnp.concatenate([w_query, w_key, w_value, w_res], axis=1)

    def kernel(x_ref, w_ref, o_ref):
        xv = x_ref[...]                       # (B, F, E)
        wv = w_ref[...]                       # (E, 4*H*D)

        # Single wide projection matmul on the MXU (default precision, f32 accumulate).
        proj = jnp.einsum('bfe,eo->bfo', xv, wv,
                          preferred_element_type=jnp.float32)    # (B, F, 4*H*D)

        q_all = proj[..., 0 * HD:1 * HD]      # (B, F, H*D)
        k_all = proj[..., 1 * HD:2 * HD]
        v_all = proj[..., 2 * HD:3 * HD]
        res   = proj[..., 3 * HD:4 * HD]      # residual projection, already (B, F, H*D)

        # Per-head attention; H is small, so unroll at trace time (no head grid axis).
        outs = []
        for h in range(H):
            sl = slice(h * D, (h + 1) * D)
            q = q_all[..., sl]                # (B, F, D)
            k = k_all[..., sl]
            v = v_all[..., sl]

            # inner_product for this head: (B, F, F)
            s = jnp.einsum('bid,bjd->bij', q, k,
                           preferred_element_type=jnp.float32)

            # softmax over the BATCH axis (== F.softmax(..., dim=1) on the (H,B,F,F) tensor).
            m = jnp.max(s, axis=0, keepdims=True)
            e = jnp.exp(s - m)
            denom = jnp.sum(e, axis=0, keepdims=True)
            a = e * pl.reciprocal(denom, approx=True)

            outs.append(jnp.einsum('bij,bjd->bid', a, v,
                                   preferred_element_type=jnp.float32))  # (B, F, D)

        # Heads concatenated head-major along the last dim == torch.cat(torch.split(result, 1), -1)
        r = jnp.concatenate(outs, axis=-1)                      # (B, F, H*D)
        o_ref[...] = jnp.maximum(r + res, 0.0).astype(o_ref.dtype)

    # Small shapes -> everything fits comfortably in VMEM; single grid step.
    # (For production AutoInt sizes on v7x, add a grid axis tiling the query-field
    #  dimension -- the batch-axis softmax is unaffected by query-field tiling.)
    return pl.pallas_call(
        kernel,
        out_shape=jax.ShapeDtypeStruct((B, Fdim, HD), jnp.float32),
        grid_spec=pltpu.PrefetchScalarGridSpec(
            num_scalar_prefetch=0,
            grid=(1,),
            in_specs=[
                pl.BlockSpec((B, Fdim, E), lambda i: (0, 0, 0)),   # full input
                pl.BlockSpec((E, 4 * HD), lambda i: (0, 0)),       # fused [Q|K|V|Res] weights
            ],
            out_specs=pl.BlockSpec((B, Fdim, HD), lambda i: (0, 0, 0)),
        ),
        compiler_params=pltpu.CompilerParams(
            dimension_semantics=("arbitrary",),
            vmem_limit_bytes=32 * 1024 * 1024,
        ),
    )(x, w_all)


def interacting_layer_reference(x, w_query, w_key, w_value, w_res, D, H):
    """Plain-JAX re-implementation of the PyTorch forward (for verification)."""
    B, Fdim, E = x.shape
    q = jnp.einsum('bfe,eo->bfo', x, w_query)
    k = jnp.einsum('bfe,eo->bfo', x, w_key)
    v = jnp.einsum('bfe,eo->bfo', x, w_value)
    # stack(split(., D, dim=2)) -> (H, B, F, D)
    split = lambda t: jnp.stack(jnp.split(t, H, axis=2), axis=0)
    q, k, v = split(q), split(k), split(v)
    s = jnp.einsum('hbik,hbjk->hbij', q, k)          # (H, B, F, F)
    a = jax.nn.softmax(s, axis=1)                    # softmax over batch dim (dim=1), as in source
    r = jnp.einsum('hbij,hbjd->hbid', a, v)          # (H, B, F, D)
    r = jnp.transpose(r, (1, 2, 0, 3)).reshape(B, Fdim, H * D)
    r = r + jnp.einsum('bfe,eo->bfo', x, w_res)
    return jnp.maximum(r, 0.0)


if __name__ == "__main__":
    # Small, module-consistent shapes.
    B, Fdim, E = 4, 8, 32            # batch, field_size, embedding_size (= in_features)
    D, H = 8, 2                      # att_embedding_size, head_num

    key = jax.random.PRNGKey(0)
    kx, kq, kk, kv, kr = jax.random.split(key, 5)
    x = jax.random.normal(kx, (B, Fdim, E), dtype=jnp.float32)
    # nn.init.normal_(tensor, mean=0.0, std=0.05)
    w_query = 0.05 * jax.random.normal(kq, (E, D * H), dtype=jnp.float32)
    w_key   = 0.05 * jax.random.normal(kk, (E, D * H), dtype=jnp.float32)
    w_value = 0.05 * jax.random.normal(kv, (E, D * H), dtype=jnp.float32)
    w_res   = 0.05 * jax.random.normal(kr, (E, D * H), dtype=jnp.float32)

    out = interacting_layer(x, w_query, w_key, w_value, w_res, D, H)
    out = jax.block_until_ready(out)

    ref = interacting_layer_reference(x, w_query, w_key, w_value, w_res, D, H)
    assert out.shape == (B, Fdim, D * H), out.shape
    # Tolerance accounts for default-precision (bf16-pass) MXU matmuls and the
    # approximate EUP reciprocal used in the softmax.
    assert jnp.allclose(out, ref, rtol=1e-2, atol=1e-2), float(jnp.max(jnp.abs(out - ref)))

    print("KERNEL_OK")
</pallas_src>

<mosaic_0001>
module attributes {stable_mosaic.version = 11 : i64} {
  func.func @kernel(%arg0: i32, %arg1: memref<4x8x32xf32, #tpu.memory_space<vmem>>, %arg2: memref<32x64xf32, #tpu.memory_space<vmem>>, %arg3: memref<4x8x16xf32, #tpu.memory_space<vmem>>) attributes {dimension_semantics = [#tpu.dimension_semantics<arbitrary>], iteration_bounds = array<i64: 1>, scalar_prefetch = 0 : i64, scratch_operands = 0 : i64, tpu.core_type = #tpu.core_type<tc>, window_params = [{pipeline_mode = #tpu.pipeline_mode<synchronous>, transform_indices = @transform_0, window_bounds = array<i64: 4, 8, 32>}, {pipeline_mode = #tpu.pipeline_mode<synchronous>, transform_indices = @transform_1, window_bounds = array<i64: 32, 64>}, {pipeline_mode = #tpu.pipeline_mode<synchronous>, transform_indices = @transform_2, window_bounds = array<i64: 4, 8, 16>}]} {
    %c0 = arith.constant 0 : index
    %c0_0 = arith.constant 0 : index
    %c0_1 = arith.constant 0 : index
    %0 = vector.load %arg1[%c0, %c0_0, %c0_1] : memref<4x8x32xf32, #tpu.memory_space<vmem>>, vector<4x8x32xf32>
    %c0_2 = arith.constant 0 : index
    %c0_3 = arith.constant 0 : index
    %1 = vector.load %arg2[%c0_2, %c0_3] : memref<32x64xf32, #tpu.memory_space<vmem>>, vector<32x64xf32>
    "tpu.trace_start"() <{level = 10 : i32, message = "bfe,eo->bfo"}> : () -> ()
    %cst = arith.constant dense<0.000000e+00> : vector<4x8x64xf32>
    %2 = tpu.matmul %0, %1, %cst {dimension_numbers = #tpu.dot_dimension_numbers<[2], [0], [0, 1], [1], [0, 0, 0, 1, 1, 1], [], []>} : vector<4x8x32xf32>, vector<32x64xf32>, vector<4x8x64xf32> -> vector<4x8x64xf32>
    "tpu.trace_stop"() : () -> ()
    %3 = vector.extract_strided_slice %2 {offsets = [0, 0, 0], sizes = [4, 8, 16], strides = [1, 1, 1]} : vector<4x8x64xf32> to vector<4x8x16xf32>
    %4 = vector.extract_strided_slice %2 {offsets = [0, 0, 16], sizes = [4, 8, 16], strides = [1, 1, 1]} : vector<4x8x64xf32> to vector<4x8x16xf32>
    %5 = vector.extract_strided_slice %2 {offsets = [0, 0, 32], sizes = [4, 8, 16], strides = [1, 1, 1]} : vector<4x8x64xf32> to vector<4x8x16xf32>
    %6 = vector.extract_strided_slice %2 {offsets = [0, 0, 48], sizes = [4, 8, 16], strides = [1, 1, 1]} : vector<4x8x64xf32> to vector<4x8x16xf32>
    %7 = vector.extract_strided_slice %3 {offsets = [0, 0, 0], sizes = [4, 8, 8], strides = [1, 1, 1]} : vector<4x8x16xf32> to vector<4x8x8xf32>
    %8 = vector.extract_strided_slice %4 {offsets = [0, 0, 0], sizes = [4, 8, 8], strides = [1, 1, 1]} : vector<4x8x16xf32> to vector<4x8x8xf32>
    %9 = vector.extract_strided_slice %5 {offsets = [0, 0, 0], sizes = [4, 8, 8], strides = [1, 1, 1]} : vector<4x8x16xf32> to vector<4x8x8xf32>
    "tpu.trace_start"() <{level = 10 : i32, message = "bid,bjd->bij"}> : () -> ()
    %cst_4 = arith.constant dense<0.000000e+00> : vector<4x8x8xf32>
    %10 = tpu.matmul %7, %8, %cst_4 {dimension_numbers = #tpu.dot_dimension_numbers<[2], [2], [1], [1], [0, 0, 0, 1, 1, 1], [0], [0]>} : vector<4x8x8xf32>, vector<4x8x8xf32>, vector<4x8x8xf32> -> vector<4x8x8xf32>
    "tpu.trace_stop"() : () -> ()
    %cst_5 = arith.constant dense<0xFF800000> : vector<8x8xf32>
    %11 = vector.multi_reduction <maximumf>, %10, %cst_5 [0] : vector<4x8x8xf32> to vector<8x8xf32>
    %12 = vector.shape_cast %11 : vector<8x8xf32> to vector<1x8x8xf32>
    %13 = vector.broadcast %12 : vector<1x8x8xf32> to vector<4x8x8xf32>
    %14 = arith.subf %10, %13 : vector<4x8x8xf32>
    %15 = math.exp %14 : vector<4x8x8xf32>
    %cst_6 = arith.constant dense<0.000000e+00> : vector<8x8xf32>
    %16 = vector.multi_reduction <add>, %15, %cst_6 [0] : vector<4x8x8xf32> to vector<8x8xf32>
    %17 = vector.shape_cast %16 : vector<8x8xf32> to vector<1x8x8xf32>
    %18 = tpu.reciprocal %17 {approx = true} : vector<1x8x8xf32> -> vector<1x8x8xf32>
    %19 = vector.broadcast %18 : vector<1x8x8xf32> to vector<4x8x8xf32>
    %20 = arith.mulf %15, %19 : vector<4x8x8xf32>
    "tpu.trace_start"() <{level = 10 : i32, message = "bij,bjd->bid"}> : () -> ()
    %cst_7 = arith.constant dense<0.000000e+00> : vector<4x8x8xf32>
    %21 = tpu.matmul %20, %9, %cst_7 {dimension_numbers = #tpu.dot_dimension_numbers<[2], [1], [1], [2], [0, 0, 0, 1, 1, 2], [0], [0]>} : vector<4x8x8xf32>, vector<4x8x8xf32>, vector<4x8x8xf32> -> vector<4x8x8xf32>
    "tpu.trace_stop"() : () -> ()
    %22 = vector.extract_strided_slice %3 {offsets = [0, 0, 8], sizes = [4, 8, 8], strides = [1, 1, 1]} : vector<4x8x16xf32> to vector<4x8x8xf32>
    %23 = vector.extract_strided_slice %4 {offsets = [0, 0, 8], sizes = [4, 8, 8], strides = [1, 1, 1]} : vector<4x8x16xf32> to vector<4x8x8xf32>
    %24 = vector.extract_strided_slice %5 {offsets = [0, 0, 8], sizes = [4, 8, 8], strides = [1, 1, 1]} : vector<4x8x16xf32> to vector<4x8x8xf32>
    "tpu.trace_start"() <{level = 10 : i32, message = "bid,bjd->bij"}> : () -> ()
    %cst_8 = arith.constant dense<0.000000e+00> : vector<4x8x8xf32>
    %25 = tpu.matmul %22, %23, %cst_8 {dimension_numbers = #tpu.dot_dimension_numbers<[2], [2], [1], [1], [0, 0, 0, 1, 1, 1], [0], [0]>} : vector<4x8x8xf32>, vector<4x8x8xf32>, vector<4x8x8xf32> -> vector<4x8x8xf32>
    "tpu.trace_stop"() : () -> ()
    %cst_9 = arith.constant dense<0xFF800000> : vector<8x8xf32>
    %26 = vector.multi_reduction <maximumf>, %25, %cst_9 [0] : vector<4x8x8xf32> to vector<8x8xf32>
    %27 = vector.shape_cast %26 : vector<8x8xf32> to vector<1x8x8xf32>
    %28 = vector.broadcast %27 : vector<1x8x8xf32> to vector<4x8x8xf32>
    %29 = arith.subf %25, %28 : vector<4x8x8xf32>
    %30 = math.exp %29 : vector<4x8x8xf32>
    %cst_10 = arith.constant dense<0.000000e+00> : vector<8x8xf32>
    %31 = vector.multi_reduction <add>, %30, %cst_10 [0] : vector<4x8x8xf32> to vector<8x8xf32>
    %32 = vector.shape_cast %31 : vector<8x8xf32> to vector<1x8x8xf32>
    %33 = tpu.reciprocal %32 {approx = true} : vector<1x8x8xf32> -> vector<1x8x8xf32>
    %34 = vector.broadcast %33 : vector<1x8x8xf32> to vector<4x8x8xf32>
    %35 = arith.mulf %30, %34 : vector<4x8x8xf32>
    "tpu.trace_start"() <{level = 10 : i32, message = "bij,bjd->bid"}> : () -> ()
    %cst_11 = arith.constant dense<0.000000e+00> : vector<4x8x8xf32>
    %36 = tpu.matmul %35, %24, %cst_11 {dimension_numbers = #tpu.dot_dimension_numbers<[2], [1], [1], [2], [0, 0, 0, 1, 1, 2], [0], [0]>} : vector<4x8x8xf32>, vector<4x8x8xf32>, vector<4x8x8xf32> -> vector<4x8x8xf32>
    "tpu.trace_stop"() : () -> ()
    %37 = tpu.concatenate %21, %36 in 2 : vector<4x8x8xf32>, vector<4x8x8xf32> -> vector<4x8x16xf32>
    %38 = arith.addf %37, %6 : vector<4x8x16xf32>
    %cst_12 = arith.constant 0.000000e+00 : f32
    %39 = vector.broadcast %cst_12 : f32 to vector<4x8x16xf32>
    %40 = arith.maximumf %38, %39 : vector<4x8x16xf32>
    %c0_13 = arith.constant 0 : index
    %c0_14 = arith.constant 0 : index
    %c0_15 = arith.constant 0 : index
    %41 = vector.load %arg3[%c0_13, %c0_14, %c0_15] : memref<4x8x16xf32, #tpu.memory_space<vmem>>, vector<4x8x16xf32>
    tpu.vector_store %arg3[%c0_13, %c0_14, %c0_15], %40 {strides = array<i32>} : memref<4x8x16xf32, #tpu.memory_space<vmem>>, vector<4x8x16xf32>,
    return
  }
  func.func @transform_0(%arg0: i32) -> (i32, i32, i32) {
    %c0_i32 = arith.constant 0 : i32
    %c0_i32_0 = arith.constant 0 : i32
    %c0_i32_1 = arith.constant 0 : i32
    %c0_i32_2 = arith.constant 0 : i32
    return %c0_i32, %c0_i32_0, %c0_i32_1 : i32, i32, i32
  }
  func.func @transform_1(%arg0: i32) -> (i32, i32) {
    %c0_i32 = arith.constant 0 : i32
    %c0_i32_0 = arith.constant 0 : i32
    %c0_i32_1 = arith.constant 0 : i32
    return %c0_i32, %c0_i32_0 : i32, i32
  }
  func.func @transform_2(%arg0: i32) -> (i32, i32, i32) {
    %c0_i32 = arith.constant 0 : i32
    %c0_i32_0 = arith.constant 0 : i32
    %c0_i32_1 = arith.constant 0 : i32
    %c0_i32_2 = arith.constant 0 : i32
    return %c0_i32, %c0_i32_0, %c0_i32_1 : i32, i32, i32
  }
}

</mosaic_0001>

<bundles_post_ra>
// kernel: tpu_custom_call.1
= control target key start
LH: loop header
LB: loop body
LE: loop exit
PB: predicated region body
PF: predicated region fallthrough
CT: control target
= control target key end

     0   :  { %7 = vsyncpa [#allocation3], 0  ;;  %s1986_s0 = inlined_call_operand.hbm [shape: f32[4,8,32], index: 0, kind: input, shape index: {}]   ;;  %s1987_s1 = inlined_call_operand.hbm [shape: f32[32,64], index: 1, kind: input, shape index: {}]   ;;  %s1988_s2 = inlined_call_operand.hbm [shape: f32[4,8,16], index: 2, kind: output, shape index: {}]  }
   0x1   :  { %8 = vsyncpa [#allocation6], 0 }
   0x2   :  { %9 = vsyncpa [#allocation4], 0  ;;  %s1775_s9 = smov [#allocation2]   ;;  %s1703_s13 = scalar_lea.hbm %s1986_s0, 512 }
   0x3   :  { %s15_s10 = sshll.u32 %s1775_s9, 4  ;;  %p1704_p0 = scmp.ne.s32.totalorder %s1986_s0, %s1703_s13  ;;  %s16_s10 = int_to_ptr.vmem [resolvable:$true] %s15_s10 }
   0x4   :  { %p1707_p1 = scmp.lt.u32.totalorder %s1703_s13, %s1986_s0 }
   0x6   :  { %p1709_p2 = pnand %p1707_p1, %p1704_p0 }
   0x8   :  { %1712 = shalt.err (!%p1709_p2)
}
   0x9   :  { %s1713_s18 = scalar_lea.vmem %s16_s10, 512  ;;  %p1718_p4 = scmp.lt.s32.totalorder %s16_s10, %s16_s10 }
   0xa   :  { %p1714_p3 = scmp.ne.s32.totalorder %s16_s10, %s1713_s18  ;;  %p1719_p5 = scmp.lt.s32.totalorder %s1713_s18, %s1713_s18 }
   0xc   :  { %p1720_p6 = por %p1719_p5, %p1718_p4 }
   0xe   :  { %p1721_p7 = pnand %p1720_p6, %p1714_p3 }
  0x10   :  { %1724 = shalt.err (!%p1721_p7)
}
  0x11   :  { %s1776_s19 = smov 128   ;;  %s1777_s20 = smov 8  }
  0x12   :  { %21 = dma.hbm_to_vmem [thread:$0]  %s1986_s0, 512, %s16_s10, [#allocation3], %s1776_s19, %s1776_s19, %s1777_s20  }
  0x13   :  { %s1778_s23 = smov [#allocation5]   ;;  %s1725_s27 = scalar_lea.hbm %s1987_s1, 512 }
  0x14   :  { %s27_s24 = sshll.u32 %s1778_s23, 4  ;;  %p1726_p8 = scmp.ne.s32.totalorder %s1987_s1, %s1725_s27  ;;  %s28_s24 = int_to_ptr.vmem [resolvable:$true] %s27_s24 }
  0x15   :  { %p1729_p9 = scmp.lt.u32.totalorder %s1725_s27, %s1987_s1 }
  0x17   :  { %p1731_p10 = pnand %p1729_p9, %p1726_p8 }
  0x19   :  { %1734 = shalt.err (!%p1731_p10)
}
  0x1a   :  { %s1735_s4 = scalar_lea.vmem %s28_s24, 512  ;;  %p1740_p12 = scmp.lt.s32.totalorder %s28_s24, %s28_s24 }
  0x1b   :  { %p1736_p11 = scmp.ne.s32.totalorder %s28_s24, %s1735_s4  ;;  %p1741_p13 = scmp.lt.s32.totalorder %s1735_s4, %s1735_s4 }
  0x1d   :  { %p1742_p0 = por %p1741_p13, %p1740_p12 }
  0x1f   :  { %p1743_p1 = pnand %p1742_p0, %p1736_p11 }
  0x21   :  { %1746 = shalt.err (!%p1743_p1)
}
  0x22   :  { %33 = dma.hbm_to_vmem [thread:$0]  %s1987_s1, 512, %s28_s24, [#allocation6], %s1776_s19, %s1776_s19, %s1777_s20  }
  0x23   :  { %1769 = dma.done.wait [#allocation3], 512  }
  0x24   :  { %1770 = vsyncadd [#allocation3], 4294966784 }
  0x25   :  { %1771 = dma.done.wait [#allocation6], 512  }
  0x26   :  { %1772 = vsyncadd [#allocation6], 4294966784  ;;  %vm48_vm0 = vcmask 261120   ;;  %v44_v0 = vld [vmem:[#allocation5] sm:$0xff]  ;;  %v45_v1 = vld [vmem:[#allocation5 + $0x8] sm:$0xff]  ;;  %v1779_v10 = vmov 0.0  }
  0x27   :  { %v46_v2 = vld [vmem:[#allocation5 + $0x10] sm:$0xff]  ;;  %v1662_v3 = vpack.c.bf16 %v45_v1, %v44_v0  ;;  %v47_v4 = vld [vmem:[#allocation5 + $0x18] sm:$0xff]  ;;  %v40_v5 = vld [vmem:[#allocation2] sm:$0xff]  ;;  %1582 = vmatprep.subr.mxu1 %v1779_v10  ;;  %vm1780_vm1 = vmmov 0   ;;  %s1781_s1 = smov 112   ;;  %s1782_s6 = smov 96  }
  0x28   :  { %v1666_v6 = vpack.c.bf16 %v47_v4, %v46_v2  ;;  %1576 = vmatprep.mubr.msk.f32.mxu0 %vm48_vm0, %v40_v5  ;;  %v41_v7 = vld [vmem:[#allocation2 + $0x8] sm:$0xff]  ;;  %v42_v8 = vld [vmem:[#allocation2 + $0x10] sm:$0xff]  ;;  %v43_v9 = vld [vmem:[#allocation2 + $0x18] sm:$0xff]  ;;  %1584 = vmatprep.mubr.msk.f32.mxu1 %vm1780_vm1, %v1779_v10  ;;  %s1783_s7 = smov 104   ;;  %s1784_s8 = smov 120   ;;  %vm149_vm2 = vcmask 64512  }
  0x29   :  { %1663 = vmatprep.subr.bf16.mxu0 %v1662_v3  ;;  %s1785_s9 = smov 88   ;;  %s1786_s10 = smov 80   ;;  %vm1477_vm3 = vcmask 130048  }
  0x2a   :  { %1665 = vmatpush3.bf16.msra.mxu0 %v1662_v3  ;;  %s1787_s11 = smov [#allocation7]  }
  0x2b   :  { %1667 = vmatprep.subr.bf16.mxu0 %v1666_v6  ;;  %s1487_s12 = sshll.u32 %s1787_s11, 4  ;;  %s1488_s12 = int_to_ptr.vmem [resolvable:$true] %s1487_s12 }
  0x2c   :  { %s1747_s13 = scalar_lea.vmem %s1488_s12, 512  ;;  %p1752_p3 = scmp.lt.s32.totalorder %s1488_s12, %s1488_s12 }
  0x2d   :  { %p1748_p2 = scmp.ne.s32.totalorder %s1488_s12, %s1747_s13  ;;  %p1753_p4 = scmp.lt.s32.totalorder %s1747_s13, %s1747_s13 }
  0x2e   :  { %1669 = vmatpush3.bf16.msra.mxu0 %v1666_v6 }
  0x2f   :  { %1597 = vmatprep.subr.mxu0 %v1779_v10  ;;  %p1754_p5 = por %p1753_p4, %p1752_p3 }
  0x31   :  { %1577 = vmatmul.mubr.msk.f32.vlgmr.msra.gmra.mrb[0].mxu0 %vm48_vm0, %v41_v7  ;;  %p1755_p6 = pnand %p1754_p5, %p1748_p2 }
  0x32   :  { %1579 = vmatprep.mubr.msk.f32.mxu0 %vm48_vm0, %v42_v8 }
  0x35   :  { %1580 = vmatmul.mubr.msk.f32.gmra.mrb[2].mxu0 %vm48_vm0, %v43_v9 }
  0x36   :  { %1599 = vmatprep.mubr.msk.f32.mxu0 %vm1780_vm1, %v1779_v10 }
 0x104   :  { %v1578_v11 = vpop.f32.mrb[0].mxu0 }
 0x105   :  { %v127_v12 = vpop.f32.mrb[1].mxu0 }
 0x106   :  { %147 = vrot.lane.b32.xlu0 %v127_v12, %s1781_s1 }
 0x108   :  { %v1843_v13 = vpop.f32.mrb[2].mxu0 }
 0x109   :  { %v1845_v14 = vpop.f32.mrb[3].mxu0 }
 0x10a   :  { %225 = vrot.lane.b32.xlu0 %v1578_v11, %s1781_s1  ;;  %302 = vrot.lane.b32.xlu1 %v1845_v14, %s1781_s1 }
 0x10e   :  { %486 = vrot.lane.b32.xlu0 %v127_v12, %s1782_s6  ;;  %379 = vrot.lane.b32.xlu1 %v1843_v13, %s1781_s1 }
 0x112   :  { %638 = vrot.lane.b32.xlu0 %v1845_v14, %s1782_s6  ;;  %562 = vrot.lane.b32.xlu1 %v1578_v11, %s1782_s6 }
 0x116   :  { %792 = vrot.lane.b32.xlu0 %v127_v12, %s1783_s7  ;;  %714 = vrot.lane.b32.xlu1 %v1843_v13, %s1782_s6 }
 0x11a   :  { %790 = vrot.lane.b32.xlu0 %v127_v12, %s1784_s8  ;;  %870 = vrot.lane.b32.xlu1 %v1578_v11, %s1783_s7 }
 0x11e   :  { %948 = vrot.lane.b32.xlu0 %v1845_v14, %s1783_s7  ;;  %868 = vrot.lane.b32.xlu1 %v1578_v11, %s1784_s8 }
 0x122   :  { %946 = vrot.lane.b32.xlu0 %v1845_v14, %s1784_s8  ;;  %1026 = vrot.lane.b32.xlu1 %v1843_v13, %s1783_s7 }
 0x126   :  { %1133 = vrot.lane.b32.xlu0 %v127_v12, %s1785_s9  ;;  %1024 = vrot.lane.b32.xlu1 %v1843_v13, %s1784_s8 }
 0x12a   :  { %1285 = vrot.lane.b32.xlu0 %v1845_v14, %s1785_s9  ;;  %1209 = vrot.lane.b32.xlu1 %v1578_v11, %s1785_s9 }
 0x12e   :  { %1457 = vrot.lane.b32.xlu0 %v127_v12, %s1786_s10  ;;  %1361 = vrot.lane.b32.xlu1 %v1843_v13, %s1785_s9 }
 0x132   :  { %1459 = vrot.lane.b32.xlu1 %v1578_v11, %s1786_s10 }
 0x178   :  { %v148_v15 = vpop.permute.xlu0 %147 }
 0x179   :  { %1583 = vmatpush3.xpose.msk.msra.mxu1 %vm149_vm2, %v148_v15 }
 0x17a   :  { %1587 = vmatprep.subr.mxu1 %v1779_v10 }
 0x17c   :  { %1585 = vmatmul.mubr.msk.f32.vlgmr.msra.gmra.mrb[0].mxu1 %vm149_vm2, %v127_v12  ;;  %v226_v16 = vpop.permute.xlu0 %225  ;;  %v303_v17 = vpop.permute.xlu1 %302 }
 0x17d   :  { %1588 = vmatpush3.xpose.msk.msra.mxu1 %vm149_vm2, %v226_v16  ;;  %1589 = vmatprep.mubr.msk.f32.mxu1 %vm1780_vm1, %v1779_v10 }
 0x17e   :  { %1592 = vmatprep.subr.mxu1 %v1779_v10 }
 0x180   :  { %1590 = vmatmul.mubr.msk.f32.vlgmr.msra.gmra.mrb[2].mxu1 %vm149_vm2, %v1578_v11  ;;  %v380_v18 = vpop.permute.xlu1 %379  ;;  %v487_v19 = vpop.permute.xlu0 %486 }
 0x181   :  { %1593 = vmatpush3.xpose.msk.msra.mxu1 %vm149_vm2, %v303_v17  ;;  %1598 = vmatpush3.xpose.msk.msra.mxu0 %vm149_vm2, %v380_v18 }
 0x182   :  { %1594 = vmatprep.mubr.msk.f32.mxu1 %vm1780_vm1, %v1779_v10  ;;  %1602 = vmatprep.subr.mxu1 %v1779_v10 }
 0x183   :  { %1607 = vmatprep.subr.mxu0 %v1779_v10 }
 0x184   :  { %1595 = vmatmul.mubr.msk.f32.vlgmr.msra.gmra.mrb[4].mxu1 %vm149_vm2, %v1845_v14  ;;  %1600 = vmatmul.mubr.msk.f32.vlgmr.msra.gmra.mrb[4].mxu0 %vm149_vm2, %v1843_v13  ;;  %v563_v20 = vpop.permute.xlu1 %562  ;;  %v639_v54 = vpop.permute.xlu0 %638 }
 0x185   :  { %1603 = vmatpush3.msra.mxu1 %v487_v19  ;;  %1608 = vmatpush3.msra.mxu0 %v563_v20 }
 0x186   :  { %1604 = vmatprep.mubr.msk.f32.mxu1 %vm1780_vm1, %v1779_v10  ;;  %1609 = vmatprep.mubr.msk.f32.mxu0 %vm1780_vm1, %v1779_v10 }
 0x187   :  { %1612 = vmatprep.subr.mxu1 %v1779_v10  ;;  %1617 = vmatprep.subr.mxu0 %v1779_v10 }
 0x188   :  { %v715_v55 = vpop.permute.xlu1 %714  ;;  %v793_v57 = vpop.permute.xlu0 %792 }
 0x18c   :  { %v871_v58 = vpop.permute.xlu1 %870  ;;  %v791_v60 = vpop.permute.xlu0 %790 }
 0x190   :  { %v869_v61 = vpop.permute.xlu1 %868  ;;  %v949_v2 = vpop.permute.xlu0 %948 }
 0x194   :  { %v1027_v3 = vpop.permute.xlu1 %1026  ;;  %v947_v4 = vpop.permute.xlu0 %946 }
 0x198   :  { %v1025_v5 = vpop.permute.xlu1 %1024  ;;  %v1134_v6 = vpop.permute.xlu0 %1133 }
 0x19c   :  { %v1210_v7 = vpop.permute.xlu1 %1209 }
 0x24f   :  { %v220_v21 = vpop.f32.mrb[0].mxu1 }
 0x250   :  { %v1586_v22 = vpop.f32.mrb[1].mxu1  ;;  %v455_v24 = vsel %vm149_vm2, %v220_v21, -inf }
 0x253   :  { %v297_v23 = vpop.f32.mrb[2].mxu1 }
 0x254   :  { %v456_v25 = vsel %vm149_vm2, %v297_v23, -inf  ;;  %v1591_v26 = vpop.f32.mrb[3].mxu1 }
 0x255   :  { %v459_v27 = vmax.f32 %v455_v24, %v456_v25 }
 0x257   :  { %v374_v28 = vpop.f32.mrb[4].mxu1  ;;  %v451_v29 = vpop.f32.mrb[4].mxu0 }
 0x258   :  { %v457_v30 = vsel %vm149_vm2, %v374_v28, -inf  ;;  %v458_v31 = vsel %vm149_vm2, %v451_v29, -inf  ;;  %v1596_v32 = vpop.f32.mrb[5].mxu1  ;;  %v1601_v33 = vpop.f32.mrb[5].mxu0 }
 0x259   :  { %v460_v34 = vmax.f32 %v457_v30, %v458_v31 }
 0x25b   :  { %v461_v35 = vmax.f32 %v459_v27, %v460_v34 }
 0x25d   :  { %v462_v36 = vsub.f32 %v220_v21, %v461_v35  ;;  %v463_v37 = vsub.f32 %v297_v23, %v461_v35  ;;  %v464_v38 = vsub.f32 %v374_v28, %v461_v35  ;;  %v465_v39 = vsub.f32 %v451_v29, %v461_v35 }
 0x25f   :  { %v466_v40 = vmul.f32 1.442695, %v462_v36  ;;  %v468_v41 = vmul.f32 1.442695, %v463_v37  ;;  %v470_v42 = vmul.f32 1.442695, %v464_v38 }
 0x260   :  { %v472_v43 = vmul.f32 1.442695, %v465_v39 }
 0x261   :  { %1683 = vpow2.f32 %v466_v40 }
 0x262   :  { %1685 = vpow2.f32 %v468_v41 }
 0x263   :  { %1687 = vpow2.f32 %v470_v42 }
 0x264   :  { %1689 = vpow2.f32 %v472_v43 }
 0x26b   :  { %v1684_v44 = vpop.eup %1683 }
 0x26c   :  { %v1686_v45 = vpop.eup %1685  ;;  %v474_v46 = vsel %vm149_vm2, %v1684_v44, 0.0 }
 0x26d   :  { %v1688_v47 = vpop.eup %1687  ;;  %v475_v48 = vsel %vm149_vm2, %v1686_v45, 0.0 }
 0x26e   :  { %v1690_v49 = vpop.eup %1689  ;;  %v476_v50 = vadd.f32 %v475_v48, %v474_v46  ;;  %v477_v51 = vsel %vm149_vm2, %v1688_v47, 0.0 }
 0x26f   :  { %v479_v53 = vsel %vm149_vm2, %v1690_v49, 0.0 }
 0x270   :  { %v478_v52 = vadd.f32 %v477_v51, %v476_v50 }
 0x272   :  { %v480_v56 = vadd.f32 %v479_v53, %v478_v52 }
 0x274   :  { %1691 = vrcp.f32 %v480_v56 }
 0x27e   :  { %v1692_v59 = vpop.eup %1691 }
 0x27f   :  { %v482_v62 = vmul.f32 %v1692_v59, %v1684_v44  ;;  %v483_v63 = vmul.f32 %v1692_v59, %v1686_v45  ;;  %v484_v0 = vmul.f32 %v1692_v59, %v1688_v47  ;;  %v485_v1 = vmul.f32 %v1692_v59, %v1690_v49  ;;  %v1362_v59 = vpop.permute.xlu1 %1361 }
 0x281   :  { %1605 = vmatmul.mubr.msk.f32.vlgmr.msra.gmra.mrb[6].mxu1 %vm149_vm2, %v482_v62  ;;  %1610 = vmatmul.mubr.msk.f32.vlgmr.msra.gmra.mrb[6].mxu0 %vm149_vm2, %v483_v63 }
 0x282   :  { %1613 = vmatpush3.msra.mxu1 %v639_v54  ;;  %1618 = vmatpush3.msra.mxu0 %v715_v55 }
 0x283   :  { %1614 = vmatprep.mubr.msk.f32.mxu1 %vm1780_vm1, %v1779_v10  ;;  %1619 = vmatprep.mubr.msk.f32.mxu0 %vm1780_vm1, %v1779_v10 }
 0x284   :  { %1622 = vmatprep.subr.mxu1 %v1779_v10  ;;  %1627 = vmatprep.subr.mxu0 %v1779_v10 }
 0x285   :  { %1615 = vmatmul.mubr.msk.f32.vlgmr.msra.gmra.mrb[8].mxu1 %vm149_vm2, %v484_v0  ;;  %1620 = vmatmul.mubr.msk.f32.vlgmr.msra.gmra.mrb[8].mxu0 %vm149_vm2, %v485_v1 }
 0x286   :  { %1624 = vmatprep.mubr.msk.f32.mxu1 %vm1780_vm1, %v1779_v10  ;;  %1629 = vmatprep.mubr.msk.f32.mxu0 %vm1780_vm1, %v1779_v10 }
 0x289   :  { %1623 = vmatpush3.xpose.msk.msra.mxu1 %vm149_vm2, %v793_v57  ;;  %1628 = vmatpush3.xpose.msk.msra.mxu0 %vm149_vm2, %v871_v58  ;;  %v1286_v58 = vpop.permute.xlu0 %1285 }
 0x28a   :  { %1632 = vmatprep.subr.mxu1 %v1779_v10  ;;  %1637 = vmatprep.subr.mxu0 %v1779_v10 }
 0x28c   :  { %1625 = vmatmul.mubr.msk.f32.vlgmr.msra.gmra.mrb[10].mxu1 %vm149_vm2, %v791_v60  ;;  %1630 = vmatmul.mubr.msk.f32.vlgmr.msra.gmra.mrb[10].mxu0 %vm149_vm2, %v869_v61 }
 0x28d   :  { %1633 = vmatpush3.xpose.msk.msra.mxu1 %vm149_vm2, %v949_v2  ;;  %1638 = vmatpush3.xpose.msk.msra.mxu0 %vm149_vm2, %v1027_v3  ;;  %v1458_v3 = vpop.permute.xlu0 %1457 }
 0x28e   :  { %1634 = vmatprep.mubr.msk.f32.mxu1 %vm1780_vm1, %v1779_v10  ;;  %1639 = vmatprep.mubr.msk.f32.mxu0 %vm1780_vm1, %v1779_v10 }
 0x28f   :  { %1642 = vmatprep.subr.mxu1 %v1779_v10  ;;  %1647 = vmatprep.subr.mxu0 %v1779_v10 }
 0x290   :  { %1635 = vmatmul.mubr.msk.f32.vlgmr.msra.gmra.mrb[12].mxu1 %vm149_vm2, %v947_v4  ;;  %1640 = vmatmul.mubr.msk.f32.vlgmr.msra.gmra.mrb[12].mxu0 %vm149_vm2, %v1025_v5  ;;  %v1460_v4 = vpop.permute.xlu1 %1459 }
 0x291   :  { %1643 = vmatpush3.msra.mxu1 %v1134_v6  ;;  %1648 = vmatpush3.msra.mxu0 %v1210_v7 }
 0x292   :  { %1644 = vmatprep.mubr.msk.f32.mxu1 %vm1780_vm1, %v1779_v10  ;;  %1649 = vmatprep.mubr.msk.f32.mxu0 %vm1780_vm1, %v1779_v10 }
 0x293   :  { %1652 = vmatprep.subr.mxu1 %v1779_v10  ;;  %1657 = vmatprep.subr.mxu0 %v1779_v10 }
 0x354   :  { %v1927_v8 = vpop.f32.mrb[6].mxu1  ;;  %v1929_v9 = vpop.f32.mrb[6].mxu0 }
 0x355   :  { %v1606_v11 = vpop.f32.mrb[7].mxu1  ;;  %v1611_v12 = vpop.f32.mrb[7].mxu0 }
 0x358   :  { %v1931_v15 = vpop.f32.mrb[8].mxu1  ;;  %v1933_v16 = vpop.f32.mrb[8].mxu0 }
 0x359   :  { %v1616_v17 = vpop.f32.mrb[9].mxu1  ;;  %v1621_v18 = vpop.f32.mrb[9].mxu0 }
 0x35f   :  { %v864_v19 = vpop.f32.mrb[10].mxu1  ;;  %v942_v20 = vpop.f32.mrb[10].mxu0 }
 0x360   :  { %v1102_v21 = vsel %vm149_vm2, %v864_v19, -inf  ;;  %v1103_v22 = vsel %vm149_vm2, %v942_v20, -inf  ;;  %v1626_v23 = vpop.f32.mrb[11].mxu1  ;;  %v1631_v24 = vpop.f32.mrb[11].mxu0 }
 0x361   :  { %v1106_v25 = vmax.f32 %v1102_v21, %v1103_v22 }
 0x363   :  { %v1020_v26 = vpop.f32.mrb[12].mxu1  ;;  %v1098_v27 = vpop.f32.mrb[12].mxu0 }
 0x364   :  { %v1104_v28 = vsel %vm149_vm2, %v1020_v26, -inf  ;;  %v1105_v29 = vsel %vm149_vm2, %v1098_v27, -inf  ;;  %v1636_v30 = vpop.f32.mrb[13].mxu1  ;;  %v1641_v31 = vpop.f32.mrb[13].mxu0 }
 0x365   :  { %v1107_v32 = vmax.f32 %v1104_v28, %v1105_v29 }
 0x367   :  { %v1108_v33 = vmax.f32 %v1106_v25, %v1107_v32 }
 0x369   :  { %v1109_v34 = vsub.f32 %v864_v19, %v1108_v33  ;;  %v1110_v35 = vsub.f32 %v942_v20, %v1108_v33  ;;  %v1111_v36 = vsub.f32 %v1020_v26, %v1108_v33  ;;  %v1112_v37 = vsub.f32 %v1098_v27, %v1108_v33 }
 0x36b   :  { %v1113_v38 = vmul.f32 1.442695, %v1109_v34  ;;  %v1115_v39 = vmul.f32 1.442695, %v1110_v35  ;;  %v1117_v40 = vmul.f32 1.442695, %v1111_v36 }
 0x36c   :  { %v1119_v41 = vmul.f32 1.442695, %v1112_v37 }
 0x36d   :  { %1693 = vpow2.f32 %v1113_v38 }
 0x36e   :  { %1695 = vpow2.f32 %v1115_v39 }
 0x36f   :  { %1697 = vpow2.f32 %v1117_v40 }
 0x370   :  { %1699 = vpow2.f32 %v1119_v41 }
 0x377   :  { %v1694_v42 = vpop.eup %1693 }
 0x378   :  { %v1696_v43 = vpop.eup %1695  ;;  %v1121_v44 = vsel %vm149_vm2, %v1694_v42, 0.0 }
 0x379   :  { %v1698_v45 = vpop.eup %1697  ;;  %v1122_v46 = vsel %vm149_vm2, %v1696_v43, 0.0 }
 0x37a   :  { %v1700_v47 = vpop.eup %1699  ;;  %v1123_v48 = vadd.f32 %v1122_v46, %v1121_v44  ;;  %v1124_v49 = vsel %vm149_vm2, %v1698_v45, 0.0 }
 0x37b   :  { %v1126_v51 = vsel %vm149_vm2, %v1700_v47, 0.0 }
 0x37c   :  { %v1125_v50 = vadd.f32 %v1124_v49, %v1123_v48 }
 0x37e   :  { %v1127_v52 = vadd.f32 %v1126_v51, %v1125_v50 }
 0x380   :  { %1701 = vrcp.f32 %v1127_v52 }
 0x38a   :  { %v1702_v53 = vpop.eup %1701 }
 0x38b   :  { %v1129_v54 = vmul.f32 %v1702_v53, %v1694_v42  ;;  %v1130_v55 = vmul.f32 %v1702_v53, %v1696_v43  ;;  %v1131_v56 = vmul.f32 %v1702_v53, %v1698_v45  ;;  %v1132_v57 = vmul.f32 %v1702_v53, %v1700_v47 }
 0x38d   :  { %1645 = vmatmul.mubr.msk.f32.vlgmr.msra.gmra.mrb[14].mxu1 %vm149_vm2, %v1129_v54  ;;  %1650 = vmatmul.mubr.msk.f32.vlgmr.msra.gmra.mrb[14].mxu0 %vm149_vm2, %v1130_v55 }
 0x38e   :  { %1653 = vmatpush3.msra.mxu1 %v1286_v58  ;;  %1658 = vmatpush3.msra.mxu0 %v1362_v59 }
 0x38f   :  { %1654 = vmatprep.mubr.msk.f32.mxu1 %vm1780_vm1, %v1779_v10  ;;  %1659 = vmatprep.mubr.msk.f32.mxu0 %vm1780_vm1, %v1779_v10 }
 0x391   :  { %1655 = vmatmul.mubr.msk.f32.vlgmr.msra.gmra.mrb[16].mxu1 %vm149_vm2, %v1131_v56  ;;  %1660 = vmatmul.mubr.msk.f32.vlgmr.msra.gmra.mrb[16].mxu0 %vm149_vm2, %v1132_v57 }
 0x460   :  { %v1205_v60 = vpop.f32.mrb[14].mxu1  ;;  %v1281_v61 = vpop.f32.mrb[14].mxu0 }
 0x461   :  { %1441 = vrot.lane.b32.xlu0 %v1205_v60, %s1777_s20  ;;  %v1646_v62 = vpop.f32.mrb[15].mxu1  ;;  %1443 = vrot.lane.b32.xlu1 %v1281_v61, %s1777_s20  ;;  %v1651_v63 = vpop.f32.mrb[15].mxu0 }
 0x464   :  { %v1357_v0 = vpop.f32.mrb[16].mxu1  ;;  %v1433_v1 = vpop.f32.mrb[16].mxu0 }
 0x465   :  { %1445 = vrot.lane.b32.xlu0 %v1357_v0, %s1777_s20  ;;  %v1656_v2 = vpop.f32.mrb[17].mxu1  ;;  %1447 = vrot.lane.b32.xlu1 %v1433_v1, %s1777_s20  ;;  %v1661_v10 = vpop.f32.mrb[17].mxu0 }
 0x469   :  { %1461 = vrot.lane.b32.xlu0 %v1845_v14, %s1786_s10  ;;  %1463 = vrot.lane.b32.xlu1 %v1843_v13, %s1786_s10 }
 0x4d3   :  { %v1442_v5 = vpop.permute.xlu0 %1441  ;;  %v1444_v6 = vpop.permute.xlu1 %1443 }
 0x4d4   :  { %v1453_v7 = vsel %vm149_vm2, %v1927_v8, %v1442_v5  ;;  %v1454_v11 = vsel %vm149_vm2, %v1929_v9, %v1444_v6 }
 0x4d5   :  { %v1469_v12 = vadd.f32 %v1458_v3, %v1453_v7  ;;  %v1470_v17 = vadd.f32 %v1460_v4, %v1454_v11 }
 0x4d7   :  { %v1473_v18 = vmax.f32 %v1469_v12, 0.0  ;;  %v1474_v19 = vmax.f32 %v1470_v17, 0.0  ;;  %v1446_v20 = vpop.permute.xlu0 %1445  ;;  %v1448_v14 = vpop.permute.xlu1 %1447 }
 0x4d8   :  { %v1455_v13 = vsel %vm149_vm2, %v1931_v15, %v1446_v20  ;;  %v1456_v8 = vsel %vm149_vm2, %v1933_v16, %v1448_v14 }
 0x4d9   :  { %1478 = vst.msk [vmem:[#allocation7] sm:$0xff] %vm1477_vm3, %v1473_v18  ;;  %1479 = vst.msk [vmem:[#allocation7 + $0x8] sm:$0xff] %vm1477_vm3, %v1474_v19 }
 0x4db   :  { %v1462_v21 = vpop.permute.xlu0 %1461  ;;  %v1464_v22 = vpop.permute.xlu1 %1463 }
 0x4dc   :  { %v1471_v9 = vadd.f32 %v1462_v21, %v1455_v13  ;;  %v1472_v23 = vadd.f32 %v1464_v22, %v1456_v8 }
 0x4de   :  { %v1475_v24 = vmax.f32 %v1471_v9, 0.0  ;;  %v1476_v25 = vmax.f32 %v1472_v23, 0.0 }
 0x4e0   :  { %1480 = vst.msk [vmem:[#allocation7 + $0x10] sm:$0xff] %vm1477_vm3, %v1475_v24  ;;  %1481 = vst.msk [vmem:[#allocation7 + $0x18] sm:$0xff] %vm1477_vm3, %v1476_v25 }
 0x4e1   :  { %1758 = shalt.err (!%p1755_p6)
}
 0x4e2   :  { %s1759_s16 = scalar_lea.hbm %s1988_s2, 512 }
 0x4e3   :  { %p1760_p7 = scmp.ne.s32.totalorder %s1988_s2, %s1759_s16  ;;  %p1763_p8 = scmp.lt.u32.totalorder %s1759_s16, %s1988_s2 }
 0x4e5   :  { %p1765_p9 = pnand %p1763_p8, %p1760_p7 }
 0x4e7   :  { %1768 = shalt.err (!%p1765_p9)
}
 0x4e8   :  { %1493 = dma.vmem_to_hbm [thread:$0]  %s1488_s12, 512, %s1988_s2, [#allocation4], %s1776_s19, %s1776_s19, %s1777_s20  }
 0x4e9   :  { %1773 = dma.done.wait [#allocation4], 512  }
 0x4ea   :  { %1774 = vsyncadd [#allocation4], 4294966784 }
 0x4eb   :  { %1497 = vsyncpa [#allocation3], 1 }
 0x4ec   :  { %1498 = vsyncpa [#allocation6], 1 }
 0x4ed   :  { %1499 = vsyncpa [#allocation4], 1 }

</bundles_post_ra>
